<compile_context>
chip_gen: v7x
topology: tpu7x:2x2x1
jax: 0.10.0
libtpu: 0.0.40
codegen_flags: <defaults>
</compile_context>

<pallas_src>
import jax
import jax.numpy as jnp
from jax import lax
from jax.experimental import pallas as pl
from jax.experimental.pallas import tpu as pltpu


# Contract the last dims of both operands: (M, K) . (N, K) -> (M, N) == A @ B.T
_DN_LAST_LAST = (((1,), (1,)), ((), ()))


def _sdpa_kernel(q_ref, x_kv_ref, wkv_ref, wo_ref, o_ref, acc_ref):
    j = pl.program_id(0)
    n_kv = pl.num_programs(0)
    mxu_dtype = x_kv_ref.dtype          # feed the MXU in the input dtype
    D = q_ref.shape[-1]

    @pl.when(j == 0)
    def _init():
        acc_ref[...] = jnp.zeros_like(acc_ref)

    # Fused K/V projection for this KV tile: (tkv, 2D) = x_kv @ [Wk; Wv].T
    kv = lax.dot_general(x_kv_ref[...], wkv_ref[...],
                         dimension_numbers=_DN_LAST_LAST,
                         preferred_element_type=jnp.float32)
    k_blk = kv[:, :D].astype(mxu_dtype)
    v_blk = kv[:, D:]

    # Score column block (S, tkv) = Q_scaled @ K_blk.T (scale folded into Q,
    # no in-kernel transpose: last-dim contraction feeds the MXU directly).
    s = lax.dot_general(q_ref[...], k_blk,
                        dimension_numbers=_DN_LAST_LAST,
                        preferred_element_type=jnp.float32)

    # torch.softmax(dim=0): normalize over queries per key column ->
    # column-local, so it completes inside this KV block.
    m = jnp.max(s, axis=0, keepdims=True)
    e = jnp.exp(s - m)
    denom = jnp.sum(e, axis=0, keepdims=True)           # (1, tkv)
    # Exact reciprocal (1e-5 accuracy budget).  Normalization is moved onto V:
    # the key axis is the contraction axis, so e @ (V/denom) == (e/denom) @ V,
    # replacing an (S, tkv) VPU multiply with a (tkv, D) one.
    inv = pl.reciprocal(denom, approx=False).reshape(-1, 1)   # (tkv, 1)
    v_scaled = (v_blk * inv).astype(mxu_dtype)

    # Accumulate weights @ V over KV tiles in f32.
    acc_ref[...] += jnp.dot(e.astype(mxu_dtype), v_scaled,
                            preferred_element_type=jnp.float32)

    @pl.when(j == n_kv - 1)
    def _finalize():
        out = lax.dot_general(acc_ref[...].astype(mxu_dtype), wo_ref[...],
                              dimension_numbers=_DN_LAST_LAST,
                              preferred_element_type=jnp.float32)
        o_ref[...] = out.astype(o_ref.dtype)


def _vmem_limit_bytes():
    """Chip-aware VMEM limit: ~3/4 of physical capacity, capped at 100 MiB."""
    cap = 64 * 1024 * 1024
    try:
        cap = pltpu.get_tpu_info().vmem_capacity_bytes
    except Exception:
        pass
    # v7x (64 MiB) -> 48 MiB;  v5e/v6e (128 MiB) -> 96 MiB.
    return int(min(cap * 3 // 4, 100 * 1024 * 1024))


def _pick_kv_tile(S, D, itemsize, vmem_budget):
    """Largest KV tile dividing S whose working set fits the VMEM budget."""
    candidates = [t for t in (2048, 1024, 512, 256, 128) if S % t == 0]
    if not candidates:
        return S  # small / irregular S: one full-extent tile (always legal)
    # Resident set: Q + out (+ acc f32) + fused weights.
    resident = S * D * (2 * itemsize + 4) + 3 * D * D * itemsize
    for t in candidates:
        per_step = 2 * t * D * itemsize                # double-buffered x KV tile
        temps = 3 * S * t * 4 + 4 * t * D * 4          # score/exp temps + K/V temps
        if resident + per_step + temps <= vmem_budget:
            return t
    return candidates[-1]


def scaled_dot_product_attention(x, wq, wk, wv, wo):
    """x: (S, D); wq/wk/wv/wo: (D, D) in nn.Linear.weight layout (used as x@W.T).

    For best TPU efficiency D should be a multiple of 128 (ideally 256 on
    v6e/v7x) and S a multiple of the chosen KV tile; small or irregular shapes
    still run correctly via a single full-extent tile.
    """
    S, D = x.shape
    scale = 1.0 / (D ** 0.5)

    vmem_limit = _vmem_limit_bytes()
    tkv = _pick_kv_tile(S, D, x.dtype.itemsize, vmem_budget=(vmem_limit * 3) // 4)
    n_kv = S // tkv

    # Hoisted Q projection with the 1/sqrt(D) scale folded in (plain XLA matmul);
    # enters the kernel as a resident single-buffered input in the MXU feed dtype.
    q = (lax.dot_general(x, wq, dimension_numbers=_DN_LAST_LAST,
                         preferred_element_type=jnp.float32) * scale).astype(x.dtype)
    wkv = jnp.concatenate([wk, wv], axis=0)            # (2D, D) fused K/V weight

    def call(single_buffer_residents):
        def resident(shape):
            if single_buffer_residents:
                return pl.BlockSpec(shape, lambda j: (0, 0),
                                    pipeline_mode=pl.Buffered(buffer_count=1))
            return pl.BlockSpec(shape, lambda j: (0, 0))

        return pl.pallas_call(
            _sdpa_kernel,
            out_shape=jax.ShapeDtypeStruct((S, D), x.dtype),
            grid_spec=pltpu.PrefetchScalarGridSpec(
                num_scalar_prefetch=0,
                grid=(n_kv,),
                in_specs=[
                    resident((S, D)),                           # scaled Q (resident)
                    pl.BlockSpec((tkv, D), lambda j: (j, 0)),   # x KV tile (pipelined)
                    resident((2 * D, D)),                       # [Wk; Wv]
                    resident((D, D)),                           # Wo
                ],
                out_specs=resident((S, D)),
                scratch_shapes=[
                    pltpu.VMEM((S, D), jnp.float32),            # weights@V accumulator
                ],
            ),
            compiler_params=pltpu.CompilerParams(
                # The KV axis reduces into the resident accumulator.
                dimension_semantics=("arbitrary",),
                vmem_limit_bytes=vmem_limit,
            ),
        )(q, x, wkv, wo)

    try:
        return call(True)
    except Exception:
        # Fallback if this JAX build rejects single-buffered resident BlockSpecs.
        return call(False)


def _reference(x, wq, wk, wv, wo):
    q = x @ wq.T
    k = x @ wk.T
    v = x @ wv.T
    scores = (q @ k.T) / (x.shape[-1] ** 0.5)
    weights = jax.nn.softmax(scores, axis=0)
    return (weights @ v) @ wo.T


if __name__ == "__main__":
    # Small demo shapes for the correctness run; production callers should pad
    # d_model to a multiple of 128 for lane-dense stores and full MXU tiles.
    seq_len, d_model = 8, 32

    key = jax.random.PRNGKey(0)
    kx, kq, kk, kv, ko = jax.random.split(key, 5)

    x = jax.random.normal(kx, (seq_len, d_model), dtype=jnp.float32)
    # Deterministic nn.Linear-style init (uniform in [-1/sqrt(d), 1/sqrt(d)]).
    bound = 1.0 / (d_model ** 0.5)
    init = lambda k: jax.random.uniform(
        k, (d_model, d_model), dtype=jnp.float32, minval=-bound, maxval=bound)
    wq, wk, wv, wo = init(kq), init(kk), init(kv), init(ko)

    out = scaled_dot_product_attention(x, wq, wk, wv, wo)
    out = jax.block_until_ready(out)

    ref = _reference(x, wq, wk, wv, wo)
    assert out.shape == (seq_len, d_model)
    assert jnp.allclose(out, ref, atol=1e-5, rtol=1e-5)

    print("KERNEL_OK")
</pallas_src>

<mosaic_0001>
module attributes {stable_mosaic.version = 11 : i64} {
  func.func @_sdpa_kernel(%arg0: i32, %arg1: memref<8x32xf32, #tpu.memory_space<vmem>>, %arg2: memref<8x32xf32, #tpu.memory_space<vmem>>, %arg3: memref<64x32xf32, #tpu.memory_space<vmem>>, %arg4: memref<32x32xf32, #tpu.memory_space<vmem>>, %arg5: memref<8x32xf32, #tpu.memory_space<vmem>>, %arg6: memref<8x32xf32, #tpu.memory_space<vmem>>) attributes {dimension_semantics = [#tpu.dimension_semantics<arbitrary>], iteration_bounds = array<i64: 1>, scalar_prefetch = 0 : i64, scratch_operands = 1 : i64, tpu.core_type = #tpu.core_type<tc>, window_params = [{pipeline_mode = #tpu.pipeline_mode<synchronous>, transform_indices = @transform_0, window_bounds = array<i64: 8, 32>}, {transform_indices = @transform_1, window_bounds = array<i64: 8, 32>}, {pipeline_mode = #tpu.pipeline_mode<synchronous>, transform_indices = @transform_2, window_bounds = array<i64: 64, 32>}, {pipeline_mode = #tpu.pipeline_mode<synchronous>, transform_indices = @transform_3, window_bounds = array<i64: 32, 32>}, {pipeline_mode = #tpu.pipeline_mode<synchronous>, transform_indices = @transform_4, window_bounds = array<i64: 8, 32>}]} {
    %c0_i32 = arith.constant 0 : i32
    %0 = arith.cmpi eq, %arg0, %c0_i32 : i32
    %1 = arith.extui %0 : i1 to i32
    %c0_i32_0 = arith.constant 0 : i32
    %2 = arith.cmpi ne, %1, %c0_i32_0 : i32
    scf.if %2 {
      %cst_16 = arith.constant 0.000000e+00 : f32
      %28 = vector.broadcast %cst_16 : f32 to vector<8x32xf32>
      %c0_17 = arith.constant 0 : index
      %c0_18 = arith.constant 0 : index
      %29 = vector.load %arg6[%c0_17, %c0_18] : memref<8x32xf32, #tpu.memory_space<vmem>>, vector<8x32xf32>
      tpu.vector_store %arg6[%c0_17, %c0_18], %28 {strides = array<i32>} : memref<8x32xf32, #tpu.memory_space<vmem>>, vector<8x32xf32>,
    } else {
    }
    %c0 = arith.constant 0 : index
    %c0_1 = arith.constant 0 : index
    %3 = vector.load %arg2[%c0, %c0_1] : memref<8x32xf32, #tpu.memory_space<vmem>>, vector<8x32xf32>
    %c0_2 = arith.constant 0 : index
    %c0_3 = arith.constant 0 : index
    %4 = vector.load %arg3[%c0_2, %c0_3] : memref<64x32xf32, #tpu.memory_space<vmem>>, vector<64x32xf32>
    %cst = arith.constant dense<0.000000e+00> : vector<8x64xf32>
    %5 = tpu.matmul %3, %4, %cst {dimension_numbers = #tpu.dot_dimension_numbers<[1], [1], [0], [0], [0, 0, 1, 0], [], []>} : vector<8x32xf32>, vector<64x32xf32>, vector<8x64xf32> -> vector<8x64xf32>
    %6 = vector.extract_strided_slice %5 {offsets = [0, 0], sizes = [8, 32], strides = [1, 1]} : vector<8x64xf32> to vector<8x32xf32>
    %7 = vector.extract_strided_slice %5 {offsets = [0, 32], sizes = [8, 32], strides = [1, 1]} : vector<8x64xf32> to vector<8x32xf32>
    %c0_4 = arith.constant 0 : index
    %c0_5 = arith.constant 0 : index
    %8 = vector.load %arg1[%c0_4, %c0_5] : memref<8x32xf32, #tpu.memory_space<vmem>>, vector<8x32xf32>
    %cst_6 = arith.constant dense<0.000000e+00> : vector<8x8xf32>
    %9 = tpu.matmul %8, %6, %cst_6 {dimension_numbers = #tpu.dot_dimension_numbers<[1], [1], [0], [0], [0, 0, 1, 0], [], []>} : vector<8x32xf32>, vector<8x32xf32>, vector<8x8xf32> -> vector<8x8xf32>
    %cst_7 = arith.constant dense<0xFF800000> : vector<8xf32>
    %10 = vector.multi_reduction <maximumf>, %9, %cst_7 [0] : vector<8x8xf32> to vector<8xf32>
    %11 = vector.shape_cast %10 : vector<8xf32> to vector<1x8xf32>
    %12 = vector.broadcast %11 : vector<1x8xf32> to vector<8x8xf32>
    %13 = arith.subf %9, %12 : vector<8x8xf32>
    %14 = math.exp %13 : vector<8x8xf32>
    %cst_8 = arith.constant dense<0.000000e+00> : vector<8xf32>
    %15 = vector.multi_reduction <add>, %14, %cst_8 [0] : vector<8x8xf32> to vector<8xf32>
    %16 = vector.shape_cast %15 : vector<8xf32> to vector<1x8xf32>
    %17 = tpu.reciprocal %16 : vector<1x8xf32> -> vector<1x8xf32>
    %18 = vector.shape_cast %17 : vector<1x8xf32> to vector<8x1xf32>
    %19 = vector.broadcast %18 : vector<8x1xf32> to vector<8x32xf32>
    %20 = arith.mulf %7, %19 : vector<8x32xf32>
    %c0_9 = arith.constant 0 : index
    %c0_10 = arith.constant 0 : index
    %21 = vector.load %arg6[%c0_9, %c0_10] : memref<8x32xf32, #tpu.memory_space<vmem>>, vector<8x32xf32>
    %cst_11 = arith.constant dense<0.000000e+00> : vector<8x32xf32>
    %22 = tpu.matmul %14, %20, %cst_11 {dimension_numbers = #tpu.dot_dimension_numbers<[1], [0], [0], [1], [0, 0, 1, 1], [], []>} : vector<8x8xf32>, vector<8x32xf32>, vector<8x32xf32> -> vector<8x32xf32>
    %23 = arith.addf %21, %22 : vector<8x32xf32>
    %c0_12 = arith.constant 0 : index
    %c0_13 = arith.constant 0 : index
    %24 = vector.load %arg6[%c0_12, %c0_13] : memref<8x32xf32, #tpu.memory_space<vmem>>, vector<8x32xf32>
    tpu.vector_store %arg6[%c0_12, %c0_13], %23 {strides = array<i32>} : memref<8x32xf32, #tpu.memory_space<vmem>>, vector<8x32xf32>,
    %c0_i32_14 = arith.constant 0 : i32
    %25 = arith.cmpi eq, %arg0, %c0_i32_14 : i32
    %26 = arith.extui %25 : i1 to i32
    %c0_i32_15 = arith.constant 0 : i32
    %27 = arith.cmpi ne, %26, %c0_i32_15 : i32
    scf.if %27 {
      %c0_16 = arith.constant 0 : index
      %c0_17 = arith.constant 0 : index
      %28 = vector.load %arg6[%c0_16, %c0_17] : memref<8x32xf32, #tpu.memory_space<vmem>>, vector<8x32xf32>
      %c0_18 = arith.constant 0 : index
      %c0_19 = arith.constant 0 : index
      %29 = vector.load %arg4[%c0_18, %c0_19] : memref<32x32xf32, #tpu.memory_space<vmem>>, vector<32x32xf32>
      %cst_20 = arith.constant dense<0.000000e+00> : vector<8x32xf32>
      %30 = tpu.matmul %28, %29, %cst_20 {dimension_numbers = #tpu.dot_dimension_numbers<[1], [1], [0], [0], [0, 0, 1, 0], [], []>} : vector<8x32xf32>, vector<32x32xf32>, vector<8x32xf32> -> vector<8x32xf32>
      %c0_21 = arith.constant 0 : index
      %c0_22 = arith.constant 0 : index
      %31 = vector.load %arg5[%c0_21, %c0_22] : memref<8x32xf32, #tpu.memory_space<vmem>>, vector<8x32xf32>
      tpu.vector_store %arg5[%c0_21, %c0_22], %30 {strides = array<i32>} : memref<8x32xf32, #tpu.memory_space<vmem>>, vector<8x32xf32>,
    } else {
    }
    return
  }
  func.func @transform_0(%arg0: i32) -> (i32, i32) {
    %c0_i32 = arith.constant 0 : i32
    %c0_i32_0 = arith.constant 0 : i32
    %c0_i32_1 = arith.constant 0 : i32
    return %c0_i32, %c0_i32_0 : i32, i32
  }
  func.func @transform_1(%arg0: i32) -> (i32, i32) {
    %c0_i32 = arith.constant 0 : i32
    %c0_i32_0 = arith.constant 0 : i32
    return %arg0, %c0_i32 : i32, i32
  }
  func.func @transform_2(%arg0: i32) -> (i32, i32) {
    %c0_i32 = arith.constant 0 : i32
    %c0_i32_0 = arith.constant 0 : i32
    %c0_i32_1 = arith.constant 0 : i32
    return %c0_i32, %c0_i32_0 : i32, i32
  }
  func.func @transform_3(%arg0: i32) -> (i32, i32) {
    %c0_i32 = arith.constant 0 : i32
    %c0_i32_0 = arith.constant 0 : i32
    %c0_i32_1 = arith.constant 0 : i32
    return %c0_i32, %c0_i32_0 : i32, i32
  }
  func.func @transform_4(%arg0: i32) -> (i32, i32) {
    %c0_i32 = arith.constant 0 : i32
    %c0_i32_0 = arith.constant 0 : i32
    %c0_i32_1 = arith.constant 0 : i32
    return %c0_i32, %c0_i32_0 : i32, i32
  }
}

module attributes {stable_mosaic.version = 11 : i64} {
  func.func @_sdpa_kernel(%arg0: i32, %arg1: memref<8x32xf32, #tpu.memory_space<vmem>>, %arg2: memref<8x32xf32, #tpu.memory_space<vmem>>, %arg3: memref<64x32xf32, #tpu.memory_space<vmem>>, %arg4: memref<32x32xf32, #tpu.memory_space<vmem>>, %arg5: memref<8x32xf32, #tpu.memory_space<vmem>>, %arg6: memref<8x32xf32, #tpu.memory_space<vmem>>) attributes {dimension_semantics = [#tpu.dimension_semantics<arbitrary>], iteration_bounds = array<i64: 1>, scalar_prefetch = 0 : i64, scratch_operands = 1 : i64, tpu.core_type = #tpu.core_type<tc>, window_params = [{pipeline_mode = #tpu.pipeline_mode<synchronous>, transform_indices = @transform_0, window_bounds = array<i64: 8, 32>}, {transform_indices = @transform_1, window_bounds = array<i64: 8, 32>}, {pipeline_mode = #tpu.pipeline_mode<synchronous>, transform_indices = @transform_2, window_bounds = array<i64: 64, 32>}, {pipeline_mode = #tpu.pipeline_mode<synchronous>, transform_indices = @transform_3, window_bounds = array<i64: 32, 32>}, {pipeline_mode = #tpu.pipeline_mode<synchronous>, transform_indices = @transform_4, window_bounds = array<i64: 8, 32>}]} {
    %c0_i32 = arith.constant 0 : i32
    %0 = arith.cmpi eq, %arg0, %c0_i32 : i32
    %1 = arith.extui %0 : i1 to i32
    %c0_i32_0 = arith.constant 0 : i32
    %2 = arith.cmpi ne, %1, %c0_i32_0 : i32
    scf.if %2 {
      %cst_16 = arith.constant 0.000000e+00 : f32
      %28 = vector.broadcast %cst_16 : f32 to vector<8x32xf32>
      %c0_17 = arith.constant 0 : index
      %c0_18 = arith.constant 0 : index
      %29 = vector.load %arg6[%c0_17, %c0_18] : memref<8x32xf32, #tpu.memory_space<vmem>>, vector<8x32xf32>
      tpu.vector_store %arg6[%c0_17, %c0_18], %28 {strides = array<i32>} : memref<8x32xf32, #tpu.memory_space<vmem>>, vector<8x32xf32>,
    } else {
    }
    %c0 = arith.constant 0 : index
    %c0_1 = arith.constant 0 : index
    %3 = vector.load %arg2[%c0, %c0_1] : memref<8x32xf32, #tpu.memory_space<vmem>>, vector<8x32xf32>
    %c0_2 = arith.constant 0 : index
    %c0_3 = arith.constant 0 : index
    %4 = vector.load %arg3[%c0_2, %c0_3] : memref<64x32xf32, #tpu.memory_space<vmem>>, vector<64x32xf32>
    %cst = arith.constant dense<0.000000e+00> : vector<8x64xf32>
    %5 = tpu.matmul %3, %4, %cst {dimension_numbers = #tpu.dot_dimension_numbers<[1], [1], [0], [0], [0, 0, 1, 0], [], []>} : vector<8x32xf32>, vector<64x32xf32>, vector<8x64xf32> -> vector<8x64xf32>
    %6 = vector.extract_strided_slice %5 {offsets = [0, 0], sizes = [8, 32], strides = [1, 1]} : vector<8x64xf32> to vector<8x32xf32>
    %7 = vector.extract_strided_slice %5 {offsets = [0, 32], sizes = [8, 32], strides = [1, 1]} : vector<8x64xf32> to vector<8x32xf32>
    %c0_4 = arith.constant 0 : index
    %c0_5 = arith.constant 0 : index
    %8 = vector.load %arg1[%c0_4, %c0_5] : memref<8x32xf32, #tpu.memory_space<vmem>>, vector<8x32xf32>
    %cst_6 = arith.constant dense<0.000000e+00> : vector<8x8xf32>
    %9 = tpu.matmul %8, %6, %cst_6 {dimension_numbers = #tpu.dot_dimension_numbers<[1], [1], [0], [0], [0, 0, 1, 0], [], []>} : vector<8x32xf32>, vector<8x32xf32>, vector<8x8xf32> -> vector<8x8xf32>
    %cst_7 = arith.constant dense<0xFF800000> : vector<8xf32>
    %10 = vector.multi_reduction <maximumf>, %9, %cst_7 [0] : vector<8x8xf32> to vector<8xf32>
    %11 = vector.shape_cast %10 : vector<8xf32> to vector<1x8xf32>
    %12 = vector.broadcast %11 : vector<1x8xf32> to vector<8x8xf32>
    %13 = arith.subf %9, %12 : vector<8x8xf32>
    %14 = math.exp %13 : vector<8x8xf32>
    %cst_8 = arith.constant dense<0.000000e+00> : vector<8xf32>
    %15 = vector.multi_reduction <add>, %14, %cst_8 [0] : vector<8x8xf32> to vector<8xf32>
    %16 = vector.shape_cast %15 : vector<8xf32> to vector<1x8xf32>
    %17 = tpu.reciprocal %16 : vector<1x8xf32> -> vector<1x8xf32>
    %18 = vector.shape_cast %17 : vector<1x8xf32> to vector<8x1xf32>
    %19 = vector.broadcast %18 : vector<8x1xf32> to vector<8x32xf32>
    %20 = arith.mulf %7, %19 : vector<8x32xf32>
    %c0_9 = arith.constant 0 : index
    %c0_10 = arith.constant 0 : index
    %21 = vector.load %arg6[%c0_9, %c0_10] : memref<8x32xf32, #tpu.memory_space<vmem>>, vector<8x32xf32>
    %cst_11 = arith.constant dense<0.000000e+00> : vector<8x32xf32>
    %22 = tpu.matmul %14, %20, %cst_11 {dimension_numbers = #tpu.dot_dimension_numbers<[1], [0], [0], [1], [0, 0, 1, 1], [], []>} : vector<8x8xf32>, vector<8x32xf32>, vector<8x32xf32> -> vector<8x32xf32>
    %23 = arith.addf %21, %22 : vector<8x32xf32>
    %c0_12 = arith.constant 0 : index
    %c0_13 = arith.constant 0 : index
    %24 = vector.load %arg6[%c0_12, %c0_13] : memref<8x32xf32, #tpu.memory_space<vmem>>, vector<8x32xf32>
    tpu.vector_store %arg6[%c0_12, %c0_13], %23 {strides = array<i32>} : memref<8x32xf32, #tpu.memory_space<vmem>>, vector<8x32xf32>,
    %c0_i32_14 = arith.constant 0 : i32
    %25 = arith.cmpi eq, %arg0, %c0_i32_14 : i32
    %26 = arith.extui %25 : i1 to i32
    %c0_i32_15 = arith.constant 0 : i32
    %27 = arith.cmpi ne, %26, %c0_i32_15 : i32
    scf.if %27 {
      %c0_16 = arith.constant 0 : index
      %c0_17 = arith.constant 0 : index
      %28 = vector.load %arg6[%c0_16, %c0_17] : memref<8x32xf32, #tpu.memory_space<vmem>>, vector<8x32xf32>
      %c0_18 = arith.constant 0 : index
      %c0_19 = arith.constant 0 : index
      %29 = vector.load %arg4[%c0_18, %c0_19] : memref<32x32xf32, #tpu.memory_space<vmem>>, vector<32x32xf32>
      %cst_20 = arith.constant dense<0.000000e+00> : vector<8x32xf32>
      %30 = tpu.matmul %28, %29, %cst_20 {dimension_numbers = #tpu.dot_dimension_numbers<[1], [1], [0], [0], [0, 0, 1, 0], [], []>} : vector<8x32xf32>, vector<32x32xf32>, vector<8x32xf32> -> vector<8x32xf32>
      %c0_21 = arith.constant 0 : index
      %c0_22 = arith.constant 0 : index
      %31 = vector.load %arg5[%c0_21, %c0_22] : memref<8x32xf32, #tpu.memory_space<vmem>>, vector<8x32xf32>
      tpu.vector_store %arg5[%c0_21, %c0_22], %30 {strides = array<i32>} : memref<8x32xf32, #tpu.memory_space<vmem>>, vector<8x32xf32>,
    } else {
    }
    return
  }
  func.func @transform_0(%arg0: i32) -> (i32, i32) {
    %c0_i32 = arith.constant 0 : i32
    %c0_i32_0 = arith.constant 0 : i32
    %c0_i32_1 = arith.constant 0 : i32
    return %c0_i32, %c0_i32_0 : i32, i32
  }
  func.func @transform_1(%arg0: i32) -> (i32, i32) {
    %c0_i32 = arith.constant 0 : i32
    %c0_i32_0 = arith.constant 0 : i32
    return %arg0, %c0_i32 : i32, i32
  }
  func.func @transform_2(%arg0: i32) -> (i32, i32) {
    %c0_i32 = arith.constant 0 : i32
    %c0_i32_0 = arith.constant 0 : i32
    %c0_i32_1 = arith.constant 0 : i32
    return %c0_i32, %c0_i32_0 : i32, i32
  }
  func.func @transform_3(%arg0: i32) -> (i32, i32) {
    %c0_i32 = arith.constant 0 : i32
    %c0_i32_0 = arith.constant 0 : i32
    %c0_i32_1 = arith.constant 0 : i32
    return %c0_i32, %c0_i32_0 : i32, i32
  }
  func.func @transform_4(%arg0: i32) -> (i32, i32) {
    %c0_i32 = arith.constant 0 : i32
    %c0_i32_0 = arith.constant 0 : i32
    %c0_i32_1 = arith.constant 0 : i32
    return %c0_i32, %c0_i32_0 : i32, i32
  }
}

</mosaic_0001>

<bundles_post_ra>
// kernel: tpu_custom_call.1
= control target key start
LH: loop header
LB: loop body
LE: loop exit
PB: predicated region body
PF: predicated region fallthrough
CT: control target
= control target key end

     0   :  { %vm22_vm0 = vcmask 261120   ;;  %v551_v2 = vmov 0.0|0.0   ;;  %v552_v5 = vmov 0.0   ;;  %vm553_vm2 = vmmov 0   ;;  %s680_s0 = inlined_call_operand.vmem [shape: f32[8,32], index: 0, kind: input, shape index: {}]   ;;  %s681_s1 = inlined_call_operand.vmem [shape: f32[8,32], index: 1, kind: input, shape index: {}]   ;;  %s682_s2 = inlined_call_operand.vmem [shape: f32[64,32], index: 2, kind: input, shape index: {}]   ;;  %s683_s3 = inlined_call_operand.vmem [shape: f32[32,32], index: 3, kind: input, shape index: {}]   ;;  %s684_s4 = inlined_call_operand.hbm [shape: f32[8,32], index: 4, kind: output, shape index: {}]  }
   0x1   :  { %v25_v0 = vld [vmem:[%s682_s2] sm:$0xff]  ;;  %v26_v1 = vld [vmem:[%s682_s2 + $0x8] sm:$0xff]  ;;  %494 = vmatprep.subr.bf16.mxu0 %v551_v2  ;;  %vm590_vm1 = vmpackc.low %vm22_vm0, %vm22_vm0  ;;  %23 = vst.msk [vmem:[#allocation2] sm:$0xff] %vm22_vm0, %v552_v5  ;;  %473 = vmatprep.subr.mxu1 %v552_v5 }
   0x2   :  { %v495_v3 = vpack.c.bf16 %v26_v1, %v25_v0  ;;  %470 = vmatprep.mubr.msk.f32.mxu0 %vm553_vm2, %v552_v5  ;;  %475 = vmatprep.mubr.msk.f32.mxu1 %vm553_vm2, %v552_v5 }
   0x4   :  { %497 = vmatpush3.bf16.xpose.msk.msra.mxu0 %vm590_vm1, %v495_v3 }
   0x5   :  { %9 = vsyncpa [#allocation4], 0  ;;  %498 = vmatprep.subr.bf16.mxu0 %v551_v2  ;;  %v27_v6 = vld [vmem:[%s682_s2 + $0x10] sm:$0xff]  ;;  %v28_v7 = vld [vmem:[%s682_s2 + $0x18] sm:$0xff]  ;;  %vm208_vm3 = vcmask 64512   ;;  %s555_s15 = smov [#allocation3]  }
   0x6   :  { %v499_v8 = vpack.c.bf16 %v28_v7, %v27_v6  ;;  %v29_v9 = vld [vmem:[%s682_s2 + $0x20] sm:$0xff]  ;;  %v30_v10 = vld [vmem:[%s682_s2 + $0x28] sm:$0xff]  ;;  %v31_v12 = vld [vmem:[%s682_s2 + $0x30] sm:$0xff]  ;;  %s411_s16 = sshll.u32 %s555_s15, 4  ;;  %s412_s16 = int_to_ptr.vmem [resolvable:$true] %s411_s16 }
   0x7   :  { %v503_v11 = vpack.c.bf16 %v30_v10, %v29_v9  ;;  %v32_v13 = vld [vmem:[%s682_s2 + $0x38] sm:$0xff]  ;;  %v24_v15 = vld [vmem:[%s681_s1] sm:$0xff]  ;;  %v316_v43 = vld [vmem:[%s683_s3 + $0x8] sm:$0xff]  ;;  %p532_p1 = scmp.lt.s32.totalorder %s412_s16, %s412_s16 }
   0x8   :  { %v507_v14 = vpack.c.bf16 %v32_v13, %v31_v12  ;;  %v131_v18 = vld [vmem:[%s680_s0] sm:$0xff]  ;;  %s554_s0 = smov 96   ;;  %v317_v45 = vld [vmem:[%s683_s3 + $0x10] sm:$0xff]  ;;  %v318_v46 = vld [vmem:[%s683_s3 + $0x18] sm:$0xff] }
   0x9   :  { %v315_v42 = vld [vmem:[%s683_s3] sm:$0xff]  ;;  %v515_v47 = vpack.c.bf16 %v318_v46, %v317_v45  ;;  %s527_s3 = scalar_lea.vmem %s412_s16, 128 }
   0xa   :  { %v511_v44 = vpack.c.bf16 %v316_v43, %v315_v42  ;;  %v231_v48 = vld [vmem:[#allocation2] sm:$0xff]  ;;  %p528_p0 = scmp.ne.s32.totalorder %s412_s16, %s527_s3  ;;  %p533_p2 = scmp.lt.s32.totalorder %s527_s3, %s527_s3 }
   0xc   :  { %501 = vmatpush3.bf16.xpose.msk.msra.mxu0 %vm590_vm1, %v499_v8  ;;  %p534_p3 = por %p533_p2, %p532_p1 }
   0xd   :  { %502 = vmatprep.subr.bf16.mxu0 %v551_v2 }
   0xe   :  { %p535_p4 = pnand %p534_p3, %p528_p0 }
  0x14   :  { %505 = vmatpush3.bf16.xpose.msk.msra.mxu0 %vm590_vm1, %v503_v11 }
  0x15   :  { %506 = vmatprep.subr.bf16.mxu0 %v551_v2 }
  0x1c   :  { %509 = vmatpush3.bf16.xpose.msk.msra.mxu0 %vm590_vm1, %v507_v14 }
  0x23   :  { %471 = vmatmul.mubr.msk.f32.vlgmr.msra.gmra.mrb[0].mxu0 %vm22_vm0, %v24_v15 }
  0xf6   :  { %v127_v16 = vpop.f32.mrb[0].mxu0 }
  0xf7   :  { %v472_v17 = vpop.f32.mrb[1].mxu0  ;;  %474 = vmatpush3.xpose.msk.msra.mxu1 %vm22_vm0, %v127_v16 }
  0xf8   :  { %478 = vmatprep.subr.mxu1 %v552_v5 }
  0xfa   :  { %476 = vmatmul.mubr.msk.f32.vlgmr.msra.gmra.mrb[0].mxu1 %vm22_vm0, %v131_v18 }
  0xfb   :  { %480 = vmatprep.mubr.msk.f32.mxu1 %vm553_vm2, %v552_v5 }
 0x1cd   :  { %v204_v19 = vpop.f32.mrb[0].mxu1 }
 0x1ce   :  { %v209_v20 = vsel %vm208_vm3, %v204_v19, -inf  ;;  %v477_v21 = vpop.f32.mrb[1].mxu1 }
 0x1cf   :  { %v210_v22 = vrot.slane %v209_v20, 4 }
 0x1d1   :  { %v211_v23 = vmax.f32 %v209_v20, %v210_v22 }
 0x1d3   :  { %v212_v24 = vrot.slane %v211_v23, 2 }
 0x1d5   :  { %v213_v25 = vmax.f32 %v211_v23, %v212_v24 }
 0x1d7   :  { %v214_v26 = vrot.slane %v213_v25, 1 }
 0x1d9   :  { %v215_v27 = vmax.f32 %v213_v25, %v214_v26 }
 0x1db   :  { %v216_v28 = vsub.f32 %v204_v19, %v215_v27 }
 0x1dd   :  { %v217_v29 = vmul.f32 1.442695, %v216_v28 }
 0x1df   :  { %523 = vpow2.f32 %v217_v29 }
 0x1e9   :  { %v524_v30 = vpop.eup %523 }
 0x1ea   :  { %v219_v31 = vsel %vm208_vm3, %v524_v30, 0.0 }
 0x1eb   :  { %v220_v32 = vrot.slane %v219_v31, 4 }
 0x1ed   :  { %v221_v33 = vadd.f32 %v220_v32, %v219_v31 }
 0x1ef   :  { %v222_v34 = vrot.slane %v221_v33, 2 }
 0x1f1   :  { %v223_v35 = vadd.f32 %v222_v34, %v221_v33 }
 0x1f3   :  { %v224_v36 = vrot.slane %v223_v35, 1 }
 0x1f5   :  { %v225_v37 = vadd.f32 %v224_v36, %v223_v35 }
 0x1f7   :  { %525 = vrcp.f32 %v225_v37 }
 0x201   :  { %v526_v38 = vpop.eup %525 }
 0x202   :  { %228 = vbcast.lane.b32.xlu0 %v526_v38, 256 }
 0x274   :  { %v229_v39 = vpop.permute.xlu0 %228 }
 0x275   :  { %v230_v40 = vmul.f32 %v229_v39, %v127_v16 }
 0x277   :  { %233 = vrot.lane.b32.xlu0 %v230_v40, %s554_s0 }
 0x2e9   :  { %v234_v41 = vpop.permute.xlu0 %233 }
 0x2ea   :  { %479 = vmatpush3.msra.mxu1 %v234_v41 }
 0x2eb   :  { %481 = vmatmul.mubr.msk.f32.vlgmr.msra.gmra.mrb[2].mxu1 %vm208_vm3, %v524_v30  ;;  %510 = vmatprep.subr.bf16.mxu1 %v551_v2 }
 0x2ec   :  { %491 = vmatprep.mubr.msk.f32.mxu1 %vm553_vm2, %v552_v5 }
 0x2f1   :  { %513 = vmatpush3.bf16.xpose.msk.msra.mxu1 %vm590_vm1, %v511_v44 }
 0x2f2   :  { %514 = vmatprep.subr.bf16.mxu1 %v551_v2 }
 0x2f9   :  { %517 = vmatpush3.bf16.xpose.msk.msra.mxu1 %vm590_vm1, %v515_v47 }
 0x3be   :  { %v305_v49 = vpop.f32.mrb[2].mxu1 }
 0x3bf   :  { %v309_v50 = vadd.f32 %v305_v49, %v231_v48  ;;  %v482_v51 = vpop.f32.mrb[3].mxu1 }
 0x3c1   :  { %310 = vst.msk [vmem:[#allocation2] sm:$0xff] %vm22_vm0, %v309_v50 }
 0x3c8   :  { %v314_v52 = vld [vmem:[#allocation2] sm:$0xff] }
 0x3c9   :  { %492 = vmatmul.mubr.msk.f32.vlgmr.msra.gmra.mrb[4].mxu1 %vm22_vm0, %v314_v52 }
 0x49c   :  { %v400_v53 = vpop.f32.mrb[4].mxu1 }
 0x49d   :  { %404 = vst.msk [vmem:[#allocation3] sm:$0xff] %vm22_vm0, %v400_v53  ;;  %v493_v54 = vpop.f32.mrb[5].mxu1 }
 0x49e   :  { %538 = shalt.err (!%p535_p4)
}
 0x49f   :  { %s539_s19 = scalar_lea.hbm %s684_s4, 128 }
 0x4a0   :  { %p540_p5 = scmp.ne.s32.totalorder %s684_s4, %s539_s19  ;;  %p543_p6 = scmp.lt.u32.totalorder %s539_s19, %s684_s4 }
 0x4a2   :  { %p545_p7 = pnand %p543_p6, %p540_p5 }
 0x4a4   :  { %548 = shalt.err (!%p545_p7)
}
 0x4a5   :  { %414 = dma.vmem_to_hbm [thread:$0]  %s412_s16, 128, %s684_s4, [#allocation4]  }
 0x4a6   :  { %549 = dma.done.wait [#allocation4], 128  }
 0x4a7   :  { %550 = vsyncadd [#allocation4], 4294967168 }
 0x4a8   :  { %418 = vsyncpa [#allocation4], 1 }

// kernel: tpu_custom_call.1
= control target key start
LH: loop header
LB: loop body
LE: loop exit
PB: predicated region body
PF: predicated region fallthrough
CT: control target
= control target key end

     0   :  { %vm22_vm0 = vcmask 261120   ;;  %v551_v2 = vmov 0.0|0.0   ;;  %v552_v5 = vmov 0.0   ;;  %vm553_vm2 = vmmov 0   ;;  %s680_s0 = inlined_call_operand.vmem [shape: f32[8,32], index: 0, kind: input, shape index: {}]   ;;  %s681_s1 = inlined_call_operand.vmem [shape: f32[8,32], index: 1, kind: input, shape index: {}]   ;;  %s682_s2 = inlined_call_operand.vmem [shape: f32[64,32], index: 2, kind: input, shape index: {}]   ;;  %s683_s3 = inlined_call_operand.vmem [shape: f32[32,32], index: 3, kind: input, shape index: {}]   ;;  %s684_s4 = inlined_call_operand.hbm [shape: f32[8,32], index: 4, kind: output, shape index: {}]  }
   0x1   :  { %v25_v0 = vld [vmem:[%s682_s2] sm:$0xff]  ;;  %v26_v1 = vld [vmem:[%s682_s2 + $0x8] sm:$0xff]  ;;  %494 = vmatprep.subr.bf16.mxu0 %v551_v2  ;;  %vm590_vm1 = vmpackc.low %vm22_vm0, %vm22_vm0  ;;  %23 = vst.msk [vmem:[#allocation2] sm:$0xff] %vm22_vm0, %v552_v5  ;;  %473 = vmatprep.subr.mxu1 %v552_v5 }
   0x2   :  { %v495_v3 = vpack.c.bf16 %v26_v1, %v25_v0  ;;  %470 = vmatprep.mubr.msk.f32.mxu0 %vm553_vm2, %v552_v5  ;;  %475 = vmatprep.mubr.msk.f32.mxu1 %vm553_vm2, %v552_v5 }
   0x4   :  { %497 = vmatpush3.bf16.xpose.msk.msra.mxu0 %vm590_vm1, %v495_v3 }
   0x5   :  { %9 = vsyncpa [#allocation4], 0  ;;  %498 = vmatprep.subr.bf16.mxu0 %v551_v2  ;;  %v27_v6 = vld [vmem:[%s682_s2 + $0x10] sm:$0xff]  ;;  %v28_v7 = vld [vmem:[%s682_s2 + $0x18] sm:$0xff]  ;;  %vm208_vm3 = vcmask 64512   ;;  %s555_s15 = smov [#allocation3]  }
   0x6   :  { %v499_v8 = vpack.c.bf16 %v28_v7, %v27_v6  ;;  %v29_v9 = vld [vmem:[%s682_s2 + $0x20] sm:$0xff]  ;;  %v30_v10 = vld [vmem:[%s682_s2 + $0x28] sm:$0xff]  ;;  %v31_v12 = vld [vmem:[%s682_s2 + $0x30] sm:$0xff]  ;;  %s411_s16 = sshll.u32 %s555_s15, 4  ;;  %s412_s16 = int_to_ptr.vmem [resolvable:$true] %s411_s16 }
   0x7   :  { %v503_v11 = vpack.c.bf16 %v30_v10, %v29_v9  ;;  %v32_v13 = vld [vmem:[%s682_s2 + $0x38] sm:$0xff]  ;;  %v24_v15 = vld [vmem:[%s681_s1] sm:$0xff]  ;;  %v316_v43 = vld [vmem:[%s683_s3 + $0x8] sm:$0xff]  ;;  %p532_p1 = scmp.lt.s32.totalorder %s412_s16, %s412_s16 }
   0x8   :  { %v507_v14 = vpack.c.bf16 %v32_v13, %v31_v12  ;;  %v131_v18 = vld [vmem:[%s680_s0] sm:$0xff]  ;;  %s554_s0 = smov 96   ;;  %v317_v45 = vld [vmem:[%s683_s3 + $0x10] sm:$0xff]  ;;  %v318_v46 = vld [vmem:[%s683_s3 + $0x18] sm:$0xff] }
   0x9   :  { %v315_v42 = vld [vmem:[%s683_s3] sm:$0xff]  ;;  %v515_v47 = vpack.c.bf16 %v318_v46, %v317_v45  ;;  %s527_s3 = scalar_lea.vmem %s412_s16, 128 }
   0xa   :  { %v511_v44 = vpack.c.bf16 %v316_v43, %v315_v42  ;;  %v231_v48 = vld [vmem:[#allocation2] sm:$0xff]  ;;  %p528_p0 = scmp.ne.s32.totalorder %s412_s16, %s527_s3  ;;  %p533_p2 = scmp.lt.s32.totalorder %s527_s3, %s527_s3 }
   0xc   :  { %501 = vmatpush3.bf16.xpose.msk.msra.mxu0 %vm590_vm1, %v499_v8  ;;  %p534_p3 = por %p533_p2, %p532_p1 }
   0xd   :  { %502 = vmatprep.subr.bf16.mxu0 %v551_v2 }
   0xe   :  { %p535_p4 = pnand %p534_p3, %p528_p0 }
  0x14   :  { %505 = vmatpush3.bf16.xpose.msk.msra.mxu0 %vm590_vm1, %v503_v11 }
  0x15   :  { %506 = vmatprep.subr.bf16.mxu0 %v551_v2 }
  0x1c   :  { %509 = vmatpush3.bf16.xpose.msk.msra.mxu0 %vm590_vm1, %v507_v14 }
  0x23   :  { %471 = vmatmul.mubr.msk.f32.vlgmr.msra.gmra.mrb[0].mxu0 %vm22_vm0, %v24_v15 }
  0xf6   :  { %v127_v16 = vpop.f32.mrb[0].mxu0 }
  0xf7   :  { %v472_v17 = vpop.f32.mrb[1].mxu0  ;;  %474 = vmatpush3.xpose.msk.msra.mxu1 %vm22_vm0, %v127_v16 }
  0xf8   :  { %478 = vmatprep.subr.mxu1 %v552_v5 }
  0xfa   :  { %476 = vmatmul.mubr.msk.f32.vlgmr.msra.gmra.mrb[0].mxu1 %vm22_vm0, %v131_v18 }
  0xfb   :  { %480 = vmatprep.mubr.msk.f32.mxu1 %vm553_vm2, %v552_v5 }
 0x1cd   :  { %v204_v19 = vpop.f32.mrb[0].mxu1 }
 0x1ce   :  { %v209_v20 = vsel %vm208_vm3, %v204_v19, -inf  ;;  %v477_v21 = vpop.f32.mrb[1].mxu1 }
 0x1cf   :  { %v210_v22 = vrot.slane %v209_v20, 4 }
 0x1d1   :  { %v211_v23 = vmax.f32 %v209_v20, %v210_v22 }
 0x1d3   :  { %v212_v24 = vrot.slane %v211_v23, 2 }
 0x1d5   :  { %v213_v25 = vmax.f32 %v211_v23, %v212_v24 }
 0x1d7   :  { %v214_v26 = vrot.slane %v213_v25, 1 }
 0x1d9   :  { %v215_v27 = vmax.f32 %v213_v25, %v214_v26 }
 0x1db   :  { %v216_v28 = vsub.f32 %v204_v19, %v215_v27 }
 0x1dd   :  { %v217_v29 = vmul.f32 1.442695, %v216_v28 }
 0x1df   :  { %523 = vpow2.f32 %v217_v29 }
 0x1e9   :  { %v524_v30 = vpop.eup %523 }
 0x1ea   :  { %v219_v31 = vsel %vm208_vm3, %v524_v30, 0.0 }
 0x1eb   :  { %v220_v32 = vrot.slane %v219_v31, 4 }
 0x1ed   :  { %v221_v33 = vadd.f32 %v220_v32, %v219_v31 }
 0x1ef   :  { %v222_v34 = vrot.slane %v221_v33, 2 }
 0x1f1   :  { %v223_v35 = vadd.f32 %v222_v34, %v221_v33 }
 0x1f3   :  { %v224_v36 = vrot.slane %v223_v35, 1 }
 0x1f5   :  { %v225_v37 = vadd.f32 %v224_v36, %v223_v35 }
 0x1f7   :  { %525 = vrcp.f32 %v225_v37 }
 0x201   :  { %v526_v38 = vpop.eup %525 }
 0x202   :  { %228 = vbcast.lane.b32.xlu0 %v526_v38, 256 }
 0x274   :  { %v229_v39 = vpop.permute.xlu0 %228 }
 0x275   :  { %v230_v40 = vmul.f32 %v229_v39, %v127_v16 }
 0x277   :  { %233 = vrot.lane.b32.xlu0 %v230_v40, %s554_s0 }
 0x2e9   :  { %v234_v41 = vpop.permute.xlu0 %233 }
 0x2ea   :  { %479 = vmatpush3.msra.mxu1 %v234_v41 }
 0x2eb   :  { %481 = vmatmul.mubr.msk.f32.vlgmr.msra.gmra.mrb[2].mxu1 %vm208_vm3, %v524_v30  ;;  %510 = vmatprep.subr.bf16.mxu1 %v551_v2 }
 0x2ec   :  { %491 = vmatprep.mubr.msk.f32.mxu1 %vm553_vm2, %v552_v5 }
 0x2f1   :  { %513 = vmatpush3.bf16.xpose.msk.msra.mxu1 %vm590_vm1, %v511_v44 }
 0x2f2   :  { %514 = vmatprep.subr.bf16.mxu1 %v551_v2 }
 0x2f9   :  { %517 = vmatpush3.bf16.xpose.msk.msra.mxu1 %vm590_vm1, %v515_v47 }
 0x3be   :  { %v305_v49 = vpop.f32.mrb[2].mxu1 }
 0x3bf   :  { %v309_v50 = vadd.f32 %v305_v49, %v231_v48  ;;  %v482_v51 = vpop.f32.mrb[3].mxu1 }
 0x3c1   :  { %310 = vst.msk [vmem:[#allocation2] sm:$0xff] %vm22_vm0, %v309_v50 }
 0x3c8   :  { %v314_v52 = vld [vmem:[#allocation2] sm:$0xff] }
 0x3c9   :  { %492 = vmatmul.mubr.msk.f32.vlgmr.msra.gmra.mrb[4].mxu1 %vm22_vm0, %v314_v52 }
 0x49c   :  { %v400_v53 = vpop.f32.mrb[4].mxu1 }
 0x49d   :  { %404 = vst.msk [vmem:[#allocation3] sm:$0xff] %vm22_vm0, %v400_v53  ;;  %v493_v54 = vpop.f32.mrb[5].mxu1 }
 0x49e   :  { %538 = shalt.err (!%p535_p4)
}
 0x49f   :  { %s539_s19 = scalar_lea.hbm %s684_s4, 128 }
 0x4a0   :  { %p540_p5 = scmp.ne.s32.totalorder %s684_s4, %s539_s19  ;;  %p543_p6 = scmp.lt.u32.totalorder %s539_s19, %s684_s4 }
 0x4a2   :  { %p545_p7 = pnand %p543_p6, %p540_p5 }
 0x4a4   :  { %548 = shalt.err (!%p545_p7)
}
 0x4a5   :  { %414 = dma.vmem_to_hbm [thread:$0]  %s412_s16, 128, %s684_s4, [#allocation4]  }
 0x4a6   :  { %549 = dma.done.wait [#allocation4], 128  }
 0x4a7   :  { %550 = vsyncadd [#allocation4], 4294967168 }
 0x4a8   :  { %418 = vsyncpa [#allocation4], 1 }

</bundles_post_ra>
